<compile_context>
chip_gen: v7x
topology: tpu7x:2x2x1
jax: 0.10.0
libtpu: 0.0.40
codegen_flags: <defaults>
</compile_context>

<pallas_src>
from functools import partial

import jax
import jax.numpy as jnp
from jax import lax
from jax.experimental import pallas as pl
from jax.experimental.pallas import tpu as pltpu

# ----------------------------- config -------------------------------------
NUM_ACTIONS = 10   # "N3D10": 10 discrete actions
DEPTH       = 5    # episode length used by the sampler
EMBED_DIM   = 32   # action-embedding dimension
HIDDEN      = 32   # agent MLP hidden width
BATCH       = 2    # batch of sampled action lists

B_PAD = 8          # batch rows padded to one sublane group
A_PAD = 128        # action axis padded to a full lane group (lane-dense stores)

_VMEM_SPEC = pl.BlockSpec(memory_space=pltpu.MemorySpace.VMEM)  # whole array in VMEM


# ------------- Pallas kernel 1: fused DEPTH-step greedy rollout (1 grid step) -------------
def _rollout_kernel(s0_ref, w1_ref, b1_ref, w2_ref, b2_ref, emb_ref, act_ref, *, depth):
    # Loop-invariant operands: loaded / built ONCE (not per step).
    w1 = w1_ref[...]                                               # (D, H)
    b1 = b1_ref[...]                                               # (B_PAD, H)
    w2 = w2_ref[...]                                               # (H, A_PAD), zero padded lanes
    b2 = b2_ref[...]                                               # (B_PAD, A_PAD), -1e30 padded lanes
    emb = emb_ref[...]                                             # (A_PAD, D), zero padded rows
    colf = lax.broadcasted_iota(jnp.int32, (B_PAD, A_PAD), 1).astype(jnp.float32)

    def step(t, x):
        # NOTE: padded batch rows (>= bsz) run with zero state; results are sliced out.
        h = jnp.maximum(jnp.dot(x, w1, preferred_element_type=jnp.float32) + b1, 0.0)
        # padded-action masking is folded into b2 (-1e30 lanes), no per-step select needed
        logits = jnp.dot(h, w2, preferred_element_type=jnp.float32) + b2
        m = jnp.max(logits, axis=-1, keepdims=True)
        # first-max tie-break (torch.argmax semantics).  NaN logits would yield index 0;
        # inputs are finite by construction.
        first = jnp.min(jnp.where(logits >= m, colf, jnp.float32(A_PAD)),
                        axis=-1, keepdims=True)                    # (B_PAD, 1)
        onehot = (colf == first).astype(jnp.float32)               # (B_PAD, A_PAD)
        # lane-dense unmasked (8,128) store of the chosen index, broadcast across lanes
        act_ref[pl.ds(t, 1)] = jnp.broadcast_to(
            first.astype(jnp.int32)[None], (1, B_PAD, A_PAD))
        e = jnp.dot(onehot, emb, preferred_element_type=jnp.float32)   # (B_PAD, D)
        return 0.5 * x + 0.5 * e                                   # recurrent state update

    lax.fori_loop(0, depth, step, s0_ref[...], unroll=True)


@partial(jax.jit, static_argnames=("depth",))
def rollout_actions(s0p, w1, b1p, w2p, b2p, embp, depth):
    """Greedy rollout of `depth` steps fused into ONE Pallas kernel invocation.
    Inputs are the pre-padded operands built once in Agent.__init__.
    Returns (depth, B_PAD) int32 action indices (caller slices the batch rows)."""
    acts = pl.pallas_call(
        partial(_rollout_kernel, depth=depth),
        out_shape=jax.ShapeDtypeStruct((depth, B_PAD, A_PAD), jnp.int32),
        in_specs=[_VMEM_SPEC] * 6,
        out_specs=_VMEM_SPEC,
    )(s0p, w1, b1p, w2p, b2p, embp)
    return acts[:, :, 0]                                           # (depth, B_PAD)


# ------------- Pallas kernel 2: per-episode Gram matrices (1 grid step, 1 input) -------------
def _gram_kernel(apad_ref, o_ref, *, rows, bsz):
    # apad: (B, 128, D) episode embeddings, zero-padded rows.
    # out[b, i, j] = <a[b,i], a[b,j]> ; top-left (L, L) block is the episode Gram.
    for b in range(bsz):                                           # tiny, statically unrolled
        a = apad_ref[b]                                            # (128, D)
        a8 = a[:rows, :]                                           # free static sublane slice
        o_ref[b] = lax.dot_general(a8, a, (((1,), (1,)), ((), ())),
                                   preferred_element_type=jnp.float32)


@jax.jit
def effective_ranks_all_prefixes(idx_batch, embed):
    """idx_batch: (B, L) int32 action ids.  Returns (B, L) f32 where [b, l] is the
    effective rank of the Gram spectrum of the first l+1 action embeddings."""
    bsz, lmax = idx_batch.shape
    dim = embed.shape[-1]
    rows = ((lmax + 7) // 8) * 8
    a = embed[idx_batch].astype(jnp.float32)                       # (B, L, D)
    apad = jnp.zeros((bsz, 128, dim), jnp.float32).at[:, :lmax].set(a)

    g = pl.pallas_call(
        partial(_gram_kernel, rows=rows, bsz=bsz),
        out_shape=jax.ShapeDtypeStruct((bsz, rows, 128), jnp.float32),
        in_specs=[_VMEM_SPEC],
        out_specs=_VMEM_SPEC,
    )(apad)
    gram = g[:, :lmax, :lmax]                                      # (B, L, L)

    # Principal submatrix per prefix length: zero rows/cols only add zero eigenvalues.
    pref = jnp.arange(1, lmax + 1)
    r = jnp.arange(lmax)
    rowmask = (r[None, :] < pref[:, None]).astype(jnp.float32)     # (L, L)
    mask = rowmask[:, :, None] * rowmask[:, None, :]               # (L, L, L)
    gp = gram[:, None, :, :] * mask[None]                          # (B, L, L, L)

    # TODO(synk): eigen-decomposition has no clean Pallas equivalent; batched plain JAX.
    ev = jnp.clip(jnp.linalg.eigvalsh(gp), 0.0, None)              # (B, L, L)
    p = ev / jnp.maximum(ev.sum(-1, keepdims=True), 1e-12)
    logp = jnp.log(jnp.where(p > 1e-12, p, 1.0))                   # thresholded entropy
    ent = -jnp.sum(p * logp, axis=-1)
    return jnp.exp(ent)                                            # (B, L)


# -------------------------- reward: effective rank --------------------------
class EffectiveRankReward:
    """reward_F(actionlist) -> effective rank of the Gram spectrum of the stacked
    action embeddings.  `precompute` batches every prefix of every episode into one
    device computation (one Pallas Gram launch + one batched eigvalsh) and caches
    host floats, so calls from DataSet_app_fun are pure dict lookups."""

    def __init__(self, embed):
        self.embed = embed
        self._cache = {}

    def precompute(self, actionlist_batch):
        if not actionlist_batch:
            return
        lmax = max(len(a) for a in actionlist_batch)
        idx = jnp.asarray(
            [list(a) + [0] * (lmax - len(a)) for a in actionlist_batch], jnp.int32)
        ranks = jax.device_get(effective_ranks_all_prefixes(idx, self.embed))
        for b, alist in enumerate(actionlist_batch):
            for l in range(1, len(alist) + 1):
                self._cache[tuple(int(x) for x in alist[:l])] = float(ranks[b, l - 1])

    def __call__(self, actionlist):
        key = tuple(int(x) for x in actionlist)
        if key not in self._cache:          # rare fallback: one fused device call
            self.precompute([list(key)])
        return self._cache[key]


# ------------------------------ agent ---------------------------------------
class Agent:
    """Tiny deterministic policy MLP; padded / lane-aligned kernel operands are
    built ONCE here so rollout_actions does no per-call padding work."""

    def __init__(self, key):
        k1, k2, k3, k4 = jax.random.split(key, 4)
        self.w1 = 0.2 * jax.random.normal(k1, (EMBED_DIM, HIDDEN), jnp.float32)
        b1 = jnp.zeros((1, HIDDEN), jnp.float32)
        w2 = 0.2 * jax.random.normal(k2, (HIDDEN, NUM_ACTIONS), jnp.float32)
        b2 = jnp.zeros((1, NUM_ACTIONS), jnp.float32)
        self.embed = jax.random.normal(k3, (NUM_ACTIONS, EMBED_DIM), jnp.float32)
        self.init_state = jax.random.normal(k4, (BATCH, EMBED_DIM), jnp.float32)

        # --- one-time padded operands for the Pallas rollout kernel ---
        self.b1p = jnp.broadcast_to(b1, (B_PAD, HIDDEN))
        self.w2p = jnp.zeros((HIDDEN, A_PAD), jnp.float32).at[:, :NUM_ACTIONS].set(w2)
        # padded-action mask folded into the bias: -1e30 in lanes >= NUM_ACTIONS
        self.b2p = jnp.full((B_PAD, A_PAD), -1e30, jnp.float32).at[:, :NUM_ACTIONS].set(
            jnp.broadcast_to(b2, (B_PAD, NUM_ACTIONS)))
        self.embp = jnp.zeros((A_PAD, EMBED_DIM), jnp.float32).at[:NUM_ACTIONS].set(self.embed)
        self.s0p = jnp.zeros((B_PAD, EMBED_DIM), jnp.float32).at[:BATCH].set(self.init_state)


def actionlistAG_fun(Depth, batch_size, agent):
    """Greedy (deterministic) rollout of `Depth` actions per batch element.
    One Pallas launch + one device_get for the whole rollout."""
    acts = jax.device_get(rollout_actions(
        agent.s0p, agent.w1, agent.b1p, agent.w2p, agent.b2p, agent.embp,
        depth=Depth))                                              # (Depth, B_PAD)
    return [[int(acts[t, b]) for t in range(Depth)] for b in range(batch_size)]


# ------------------- dataset bookkeeping (verbatim semantics) ----------------
def DataSet_app_fun(DataXSet, DataYSet, DataRSet, DataXYSet, Depth,
                    actionlist_batch, effective_rank_F):
    Rew_batch = []
    for b in range(len(actionlist_batch)):
        actionlist = actionlist_batch[b]
        Depth = len(actionlist)
        Rew = effective_rank_F(actionlist=actionlist)
        Rew_batch.append(Rew)
        for l in range(Depth - 1):
            DataXY = actionlist[:l + 2]
            found = any((sublist == DataXY for sublist in DataXYSet))
            if not found:
                DataX = actionlist[:l + 1]
                DataY = actionlist[l + 1:l + 2]
                DataR = effective_rank_F(actionlist=DataXY)
                DataXYSet.append(DataXY)
                DataXSet.append(DataX)
                DataYSet.append(DataY)
                DataRSet.append(DataR)
    return (DataXSet, DataYSet, DataRSet, DataXYSet, Rew_batch)


class DataSet_sampler:
    """JAX/Pallas equivalent of the torch nn.Module (no learnable params itself)."""

    def __init__(self, agent, reward_F, Depth):
        self.agent = agent
        self.reward_F = reward_F
        self.Depth = Depth

    def forward(self, DataXSet, DataYSet, DataRSet, DataXYSet, batch_size):
        actionlistAG_batch = actionlistAG_fun(
            Depth=self.Depth, batch_size=batch_size, agent=self.agent)
        if hasattr(self.reward_F, "precompute"):
            self.reward_F.precompute(actionlistAG_batch)   # one batched reward pass
        DataXSet, DataYSet, DataRSet, DataXYSet, Rew_batch = DataSet_app_fun(
            DataXSet=DataXSet, DataYSet=DataYSet, DataRSet=DataRSet,
            DataXYSet=DataXYSet, Depth=self.Depth,
            actionlist_batch=actionlistAG_batch,
            effective_rank_F=self.reward_F)
        return (DataXSet, DataYSet, DataRSet, DataXYSet, Rew_batch)

    __call__ = forward


# ------------------------------------ main -----------------------------------
if __name__ == "__main__":
    key = jax.random.PRNGKey(0)
    agent = Agent(key)
    reward_F = EffectiveRankReward(agent.embed)
    sampler = DataSet_sampler(agent=agent, reward_F=reward_F, Depth=DEPTH)

    DataXSet, DataYSet, DataRSet, DataXYSet = [], [], [], []
    DataXSet, DataYSet, DataRSet, DataXYSet, Rew_batch = sampler.forward(
        DataXSet, DataYSet, DataRSet, DataXYSet, batch_size=BATCH)

    # force device completion of both Pallas kernels
    acts_dev = rollout_actions(agent.s0p, agent.w1, agent.b1p, agent.w2p,
                               agent.b2p, agent.embp, depth=DEPTH)   # (DEPTH, B_PAD)
    idx_dev = jnp.transpose(acts_dev[:, :BATCH]).astype(jnp.int32)   # (BATCH, DEPTH)
    ranks_dev = effective_ranks_all_prefixes(idx_dev, agent.embed)   # (BATCH, DEPTH)
    jax.block_until_ready((acts_dev, ranks_dev))

    assert len(Rew_batch) == BATCH
    assert all(r > 0.999 for r in Rew_batch)
    assert len(DataXSet) == len(DataYSet) == len(DataRSet) == len(DataXYSet)
    print("KERNEL_OK")
</pallas_src>

<mosaic_0001>
module attributes {stable_mosaic.version = 11 : i64} {
  func.func @_rollout_kernel(%arg0: memref<8x32xf32, #tpu.memory_space<vmem>>, %arg1: memref<32x32xf32, #tpu.memory_space<vmem>>, %arg2: memref<8x32xf32, #tpu.memory_space<vmem>>, %arg3: memref<32x128xf32, #tpu.memory_space<vmem>>, %arg4: memref<8x128xf32, #tpu.memory_space<vmem>>, %arg5: memref<128x32xf32, #tpu.memory_space<vmem>>, %arg6: memref<5x8x128xi32, #tpu.memory_space<vmem>>) attributes {dimension_semantics = [], scalar_prefetch = 0 : i64, scratch_operands = 0 : i64, tpu.core_type = #tpu.core_type<tc>} {
    %c0 = arith.constant 0 : index
    %c0_0 = arith.constant 0 : index
    %0 = vector.load %arg1[%c0, %c0_0] : memref<32x32xf32, #tpu.memory_space<vmem>>, vector<32x32xf32>
    %c0_1 = arith.constant 0 : index
    %c0_2 = arith.constant 0 : index
    %1 = vector.load %arg2[%c0_1, %c0_2] : memref<8x32xf32, #tpu.memory_space<vmem>>, vector<8x32xf32>
    %c0_3 = arith.constant 0 : index
    %c0_4 = arith.constant 0 : index
    %2 = vector.load %arg3[%c0_3, %c0_4] : memref<32x128xf32, #tpu.memory_space<vmem>>, vector<32x128xf32>
    %c0_5 = arith.constant 0 : index
    %c0_6 = arith.constant 0 : index
    %3 = vector.load %arg4[%c0_5, %c0_6] : memref<8x128xf32, #tpu.memory_space<vmem>>, vector<8x128xf32>
    %c0_7 = arith.constant 0 : index
    %c0_8 = arith.constant 0 : index
    %4 = vector.load %arg5[%c0_7, %c0_8] : memref<128x32xf32, #tpu.memory_space<vmem>>, vector<128x32xf32>
    %5 = tpu.iota {dimensions = array<i32: 1>} : vector<8x128xi32>
    %6 = arith.sitofp %5 : vector<8x128xi32> to vector<8x128xf32>
    %c0_9 = arith.constant 0 : index
    %c0_10 = arith.constant 0 : index
    %7 = vector.load %arg0[%c0_9, %c0_10] : memref<8x32xf32, #tpu.memory_space<vmem>>, vector<8x32xf32>
    %c0_i32 = arith.constant 0 : i32
    %cst = arith.constant dense<0.000000e+00> : vector<8x32xf32>
    %8 = tpu.matmul %7, %0, %cst {dimension_numbers = #tpu.dot_dimension_numbers<[1], [0], [0], [1], [0, 0, 1, 1], [], []>} : vector<8x32xf32>, vector<32x32xf32>, vector<8x32xf32> -> vector<8x32xf32>
    %9 = arith.addf %8, %1 : vector<8x32xf32>
    %cst_11 = arith.constant 0.000000e+00 : f32
    %10 = vector.broadcast %cst_11 : f32 to vector<8x32xf32>
    %11 = arith.maximumf %9, %10 : vector<8x32xf32>
    %cst_12 = arith.constant dense<0.000000e+00> : vector<8x128xf32>
    %12 = tpu.matmul %11, %2, %cst_12 {dimension_numbers = #tpu.dot_dimension_numbers<[1], [0], [0], [1], [0, 0, 1, 1], [], []>} : vector<8x32xf32>, vector<32x128xf32>, vector<8x128xf32> -> vector<8x128xf32>
    %13 = arith.addf %12, %3 : vector<8x128xf32>
    %cst_13 = arith.constant dense<0xFF800000> : vector<8xf32>
    %14 = vector.multi_reduction <maximumf>, %13, %cst_13 [1] : vector<8x128xf32> to vector<8xf32>
    %15 = vector.shape_cast %14 : vector<8xf32> to vector<8x1xf32>
    %16 = vector.broadcast %15 : vector<8x1xf32> to vector<8x128xf32>
    %17 = arith.cmpf oge, %13, %16 : vector<8x128xf32>
    %cst_14 = arith.constant 1.280000e+02 : f32
    %18 = vector.broadcast %cst_14 : f32 to vector<8x128xf32>
    %19 = arith.select %17, %6, %18 : vector<8x128xi1>, vector<8x128xf32>
    %cst_15 = arith.constant dense<0x7F800000> : vector<8xf32>
    %20 = vector.multi_reduction <minimumf>, %19, %cst_15 [1] : vector<8x128xf32> to vector<8xf32>
    %21 = vector.shape_cast %20 : vector<8xf32> to vector<8x1xf32>
    %22 = vector.broadcast %21 : vector<8x1xf32> to vector<8x128xf32>
    %23 = arith.cmpf oeq, %6, %22 : vector<8x128xf32>
    %24 = arith.extui %23 : vector<8x128xi1> to vector<8x128xi32>
    %25 = arith.sitofp %24 : vector<8x128xi32> to vector<8x128xf32>
    %26 = arith.fptosi %21 : vector<8x1xf32> to vector<8x1xi32>
    %27 = vector.shape_cast %26 : vector<8x1xi32> to vector<1x8x1xi32>
    %28 = vector.shape_cast %27 : vector<1x8x1xi32> to vector<1x8x1xi32>
    %29 = vector.broadcast %28 : vector<1x8x1xi32> to vector<1x8x128xi32>
    %30 = arith.index_cast %c0_i32 : i32 to index
    %c0_16 = arith.constant 0 : index
    %c0_17 = arith.constant 0 : index
    %31 = vector.load %arg6[%30, %c0_16, %c0_17] : memref<5x8x128xi32, #tpu.memory_space<vmem>>, vector<1x8x128xi32>
    tpu.vector_store %arg6[%30, %c0_16, %c0_17], %29 {strides = array<i32>} : memref<5x8x128xi32, #tpu.memory_space<vmem>>, vector<1x8x128xi32>,
    %cst_18 = arith.constant dense<0.000000e+00> : vector<8x32xf32>
    %32 = tpu.matmul %25, %4, %cst_18 {dimension_numbers = #tpu.dot_dimension_numbers<[1], [0], [0], [1], [0, 0, 1, 1], [], []>} : vector<8x128xf32>, vector<128x32xf32>, vector<8x32xf32> -> vector<8x32xf32>
    %cst_19 = arith.constant 5.000000e-01 : f32
    %33 = vector.broadcast %cst_19 : f32 to vector<8x32xf32>
    %34 = arith.mulf %33, %7 : vector<8x32xf32>
    %cst_20 = arith.constant 5.000000e-01 : f32
    %35 = vector.broadcast %cst_20 : f32 to vector<8x32xf32>
    %36 = arith.mulf %35, %32 : vector<8x32xf32>
    %37 = arith.addf %34, %36 : vector<8x32xf32>
    %c1_i32 = arith.constant 1 : i32
    %cst_21 = arith.constant dense<0.000000e+00> : vector<8x32xf32>
    %38 = tpu.matmul %37, %0, %cst_21 {dimension_numbers = #tpu.dot_dimension_numbers<[1], [0], [0], [1], [0, 0, 1, 1], [], []>} : vector<8x32xf32>, vector<32x32xf32>, vector<8x32xf32> -> vector<8x32xf32>
    %39 = arith.addf %38, %1 : vector<8x32xf32>
    %cst_22 = arith.constant 0.000000e+00 : f32
    %40 = vector.broadcast %cst_22 : f32 to vector<8x32xf32>
    %41 = arith.maximumf %39, %40 : vector<8x32xf32>
    %cst_23 = arith.constant dense<0.000000e+00> : vector<8x128xf32>
    %42 = tpu.matmul %41, %2, %cst_23 {dimension_numbers = #tpu.dot_dimension_numbers<[1], [0], [0], [1], [0, 0, 1, 1], [], []>} : vector<8x32xf32>, vector<32x128xf32>, vector<8x128xf32> -> vector<8x128xf32>
    %43 = arith.addf %42, %3 : vector<8x128xf32>
    %cst_24 = arith.constant dense<0xFF800000> : vector<8xf32>
    %44 = vector.multi_reduction <maximumf>, %43, %cst_24 [1] : vector<8x128xf32> to vector<8xf32>
    %45 = vector.shape_cast %44 : vector<8xf32> to vector<8x1xf32>
    %46 = vector.broadcast %45 : vector<8x1xf32> to vector<8x128xf32>
    %47 = arith.cmpf oge, %43, %46 : vector<8x128xf32>
    %cst_25 = arith.constant 1.280000e+02 : f32
    %48 = vector.broadcast %cst_25 : f32 to vector<8x128xf32>
    %49 = arith.select %47, %6, %48 : vector<8x128xi1>, vector<8x128xf32>
    %cst_26 = arith.constant dense<0x7F800000> : vector<8xf32>
    %50 = vector.multi_reduction <minimumf>, %49, %cst_26 [1] : vector<8x128xf32> to vector<8xf32>
    %51 = vector.shape_cast %50 : vector<8xf32> to vector<8x1xf32>
    %52 = vector.broadcast %51 : vector<8x1xf32> to vector<8x128xf32>
    %53 = arith.cmpf oeq, %6, %52 : vector<8x128xf32>
    %54 = arith.extui %53 : vector<8x128xi1> to vector<8x128xi32>
    %55 = arith.sitofp %54 : vector<8x128xi32> to vector<8x128xf32>
    %56 = arith.fptosi %51 : vector<8x1xf32> to vector<8x1xi32>
    %57 = vector.shape_cast %56 : vector<8x1xi32> to vector<1x8x1xi32>
    %58 = vector.shape_cast %57 : vector<1x8x1xi32> to vector<1x8x1xi32>
    %59 = vector.broadcast %58 : vector<1x8x1xi32> to vector<1x8x128xi32>
    %60 = arith.index_cast %c1_i32 : i32 to index
    %c0_27 = arith.constant 0 : index
    %c0_28 = arith.constant 0 : index
    %61 = vector.load %arg6[%60, %c0_27, %c0_28] : memref<5x8x128xi32, #tpu.memory_space<vmem>>, vector<1x8x128xi32>
    tpu.vector_store %arg6[%60, %c0_27, %c0_28], %59 {strides = array<i32>} : memref<5x8x128xi32, #tpu.memory_space<vmem>>, vector<1x8x128xi32>,
    %cst_29 = arith.constant dense<0.000000e+00> : vector<8x32xf32>
    %62 = tpu.matmul %55, %4, %cst_29 {dimension_numbers = #tpu.dot_dimension_numbers<[1], [0], [0], [1], [0, 0, 1, 1], [], []>} : vector<8x128xf32>, vector<128x32xf32>, vector<8x32xf32> -> vector<8x32xf32>
    %cst_30 = arith.constant 5.000000e-01 : f32
    %63 = vector.broadcast %cst_30 : f32 to vector<8x32xf32>
    %64 = arith.mulf %63, %37 : vector<8x32xf32>
    %cst_31 = arith.constant 5.000000e-01 : f32
    %65 = vector.broadcast %cst_31 : f32 to vector<8x32xf32>
    %66 = arith.mulf %65, %62 : vector<8x32xf32>
    %67 = arith.addf %64, %66 : vector<8x32xf32>
    %c2_i32 = arith.constant 2 : i32
    %cst_32 = arith.constant dense<0.000000e+00> : vector<8x32xf32>
    %68 = tpu.matmul %67, %0, %cst_32 {dimension_numbers = #tpu.dot_dimension_numbers<[1], [0], [0], [1], [0, 0, 1, 1], [], []>} : vector<8x32xf32>, vector<32x32xf32>, vector<8x32xf32> -> vector<8x32xf32>
    %69 = arith.addf %68, %1 : vector<8x32xf32>
    %cst_33 = arith.constant 0.000000e+00 : f32
    %70 = vector.broadcast %cst_33 : f32 to vector<8x32xf32>
    %71 = arith.maximumf %69, %70 : vector<8x32xf32>
    %cst_34 = arith.constant dense<0.000000e+00> : vector<8x128xf32>
    %72 = tpu.matmul %71, %2, %cst_34 {dimension_numbers = #tpu.dot_dimension_numbers<[1], [0], [0], [1], [0, 0, 1, 1], [], []>} : vector<8x32xf32>, vector<32x128xf32>, vector<8x128xf32> -> vector<8x128xf32>
    %73 = arith.addf %72, %3 : vector<8x128xf32>
    %cst_35 = arith.constant dense<0xFF800000> : vector<8xf32>
    %74 = vector.multi_reduction <maximumf>, %73, %cst_35 [1] : vector<8x128xf32> to vector<8xf32>
    %75 = vector.shape_cast %74 : vector<8xf32> to vector<8x1xf32>
    %76 = vector.broadcast %75 : vector<8x1xf32> to vector<8x128xf32>
    %77 = arith.cmpf oge, %73, %76 : vector<8x128xf32>
    %cst_36 = arith.constant 1.280000e+02 : f32
    %78 = vector.broadcast %cst_36 : f32 to vector<8x128xf32>
    %79 = arith.select %77, %6, %78 : vector<8x128xi1>, vector<8x128xf32>
    %cst_37 = arith.constant dense<0x7F800000> : vector<8xf32>
    %80 = vector.multi_reduction <minimumf>, %79, %cst_37 [1] : vector<8x128xf32> to vector<8xf32>
    %81 = vector.shape_cast %80 : vector<8xf32> to vector<8x1xf32>
    %82 = vector.broadcast %81 : vector<8x1xf32> to vector<8x128xf32>
    %83 = arith.cmpf oeq, %6, %82 : vector<8x128xf32>
    %84 = arith.extui %83 : vector<8x128xi1> to vector<8x128xi32>
    %85 = arith.sitofp %84 : vector<8x128xi32> to vector<8x128xf32>
    %86 = arith.fptosi %81 : vector<8x1xf32> to vector<8x1xi32>
    %87 = vector.shape_cast %86 : vector<8x1xi32> to vector<1x8x1xi32>
    %88 = vector.shape_cast %87 : vector<1x8x1xi32> to vector<1x8x1xi32>
    %89 = vector.broadcast %88 : vector<1x8x1xi32> to vector<1x8x128xi32>
    %90 = arith.index_cast %c2_i32 : i32 to index
    %c0_38 = arith.constant 0 : index
    %c0_39 = arith.constant 0 : index
    %91 = vector.load %arg6[%90, %c0_38, %c0_39] : memref<5x8x128xi32, #tpu.memory_space<vmem>>, vector<1x8x128xi32>
    tpu.vector_store %arg6[%90, %c0_38, %c0_39], %89 {strides = array<i32>} : memref<5x8x128xi32, #tpu.memory_space<vmem>>, vector<1x8x128xi32>,
    %cst_40 = arith.constant dense<0.000000e+00> : vector<8x32xf32>
    %92 = tpu.matmul %85, %4, %cst_40 {dimension_numbers = #tpu.dot_dimension_numbers<[1], [0], [0], [1], [0, 0, 1, 1], [], []>} : vector<8x128xf32>, vector<128x32xf32>, vector<8x32xf32> -> vector<8x32xf32>
    %cst_41 = arith.constant 5.000000e-01 : f32
    %93 = vector.broadcast %cst_41 : f32 to vector<8x32xf32>
    %94 = arith.mulf %93, %67 : vector<8x32xf32>
    %cst_42 = arith.constant 5.000000e-01 : f32
    %95 = vector.broadcast %cst_42 : f32 to vector<8x32xf32>
    %96 = arith.mulf %95, %92 : vector<8x32xf32>
    %97 = arith.addf %94, %96 : vector<8x32xf32>
    %c3_i32 = arith.constant 3 : i32
    %cst_43 = arith.constant dense<0.000000e+00> : vector<8x32xf32>
    %98 = tpu.matmul %97, %0, %cst_43 {dimension_numbers = #tpu.dot_dimension_numbers<[1], [0], [0], [1], [0, 0, 1, 1], [], []>} : vector<8x32xf32>, vector<32x32xf32>, vector<8x32xf32> -> vector<8x32xf32>
    %99 = arith.addf %98, %1 : vector<8x32xf32>
    %cst_44 = arith.constant 0.000000e+00 : f32
    %100 = vector.broadcast %cst_44 : f32 to vector<8x32xf32>
    %101 = arith.maximumf %99, %100 : vector<8x32xf32>
    %cst_45 = arith.constant dense<0.000000e+00> : vector<8x128xf32>
    %102 = tpu.matmul %101, %2, %cst_45 {dimension_numbers = #tpu.dot_dimension_numbers<[1], [0], [0], [1], [0, 0, 1, 1], [], []>} : vector<8x32xf32>, vector<32x128xf32>, vector<8x128xf32> -> vector<8x128xf32>
    %103 = arith.addf %102, %3 : vector<8x128xf32>
    %cst_46 = arith.constant dense<0xFF800000> : vector<8xf32>
    %104 = vector.multi_reduction <maximumf>, %103, %cst_46 [1] : vector<8x128xf32> to vector<8xf32>
    %105 = vector.shape_cast %104 : vector<8xf32> to vector<8x1xf32>
    %106 = vector.broadcast %105 : vector<8x1xf32> to vector<8x128xf32>
    %107 = arith.cmpf oge, %103, %106 : vector<8x128xf32>
    %cst_47 = arith.constant 1.280000e+02 : f32
    %108 = vector.broadcast %cst_47 : f32 to vector<8x128xf32>
    %109 = arith.select %107, %6, %108 : vector<8x128xi1>, vector<8x128xf32>
    %cst_48 = arith.constant dense<0x7F800000> : vector<8xf32>
    %110 = vector.multi_reduction <minimumf>, %109, %cst_48 [1] : vector<8x128xf32> to vector<8xf32>
    %111 = vector.shape_cast %110 : vector<8xf32> to vector<8x1xf32>
    %112 = vector.broadcast %111 : vector<8x1xf32> to vector<8x128xf32>
    %113 = arith.cmpf oeq, %6, %112 : vector<8x128xf32>
    %114 = arith.extui %113 : vector<8x128xi1> to vector<8x128xi32>
    %115 = arith.sitofp %114 : vector<8x128xi32> to vector<8x128xf32>
    %116 = arith.fptosi %111 : vector<8x1xf32> to vector<8x1xi32>
    %117 = vector.shape_cast %116 : vector<8x1xi32> to vector<1x8x1xi32>
    %118 = vector.shape_cast %117 : vector<1x8x1xi32> to vector<1x8x1xi32>
    %119 = vector.broadcast %118 : vector<1x8x1xi32> to vector<1x8x128xi32>
    %120 = arith.index_cast %c3_i32 : i32 to index
    %c0_49 = arith.constant 0 : index
    %c0_50 = arith.constant 0 : index
    %121 = vector.load %arg6[%120, %c0_49, %c0_50] : memref<5x8x128xi32, #tpu.memory_space<vmem>>, vector<1x8x128xi32>
    tpu.vector_store %arg6[%120, %c0_49, %c0_50], %119 {strides = array<i32>} : memref<5x8x128xi32, #tpu.memory_space<vmem>>, vector<1x8x128xi32>,
    %cst_51 = arith.constant dense<0.000000e+00> : vector<8x32xf32>
    %122 = tpu.matmul %115, %4, %cst_51 {dimension_numbers = #tpu.dot_dimension_numbers<[1], [0], [0], [1], [0, 0, 1, 1], [], []>} : vector<8x128xf32>, vector<128x32xf32>, vector<8x32xf32> -> vector<8x32xf32>
    %cst_52 = arith.constant 5.000000e-01 : f32
    %123 = vector.broadcast %cst_52 : f32 to vector<8x32xf32>
    %124 = arith.mulf %123, %97 : vector<8x32xf32>
    %cst_53 = arith.constant 5.000000e-01 : f32
    %125 = vector.broadcast %cst_53 : f32 to vector<8x32xf32>
    %126 = arith.mulf %125, %122 : vector<8x32xf32>
    %127 = arith.addf %124, %126 : vector<8x32xf32>
    %c4_i32 = arith.constant 4 : i32
    %cst_54 = arith.constant dense<0.000000e+00> : vector<8x32xf32>
    %128 = tpu.matmul %127, %0, %cst_54 {dimension_numbers = #tpu.dot_dimension_numbers<[1], [0], [0], [1], [0, 0, 1, 1], [], []>} : vector<8x32xf32>, vector<32x32xf32>, vector<8x32xf32> -> vector<8x32xf32>
    %129 = arith.addf %128, %1 : vector<8x32xf32>
    %cst_55 = arith.constant 0.000000e+00 : f32
    %130 = vector.broadcast %cst_55 : f32 to vector<8x32xf32>
    %131 = arith.maximumf %129, %130 : vector<8x32xf32>
    %cst_56 = arith.constant dense<0.000000e+00> : vector<8x128xf32>
    %132 = tpu.matmul %131, %2, %cst_56 {dimension_numbers = #tpu.dot_dimension_numbers<[1], [0], [0], [1], [0, 0, 1, 1], [], []>} : vector<8x32xf32>, vector<32x128xf32>, vector<8x128xf32> -> vector<8x128xf32>
    %133 = arith.addf %132, %3 : vector<8x128xf32>
    %cst_57 = arith.constant dense<0xFF800000> : vector<8xf32>
    %134 = vector.multi_reduction <maximumf>, %133, %cst_57 [1] : vector<8x128xf32> to vector<8xf32>
    %135 = vector.shape_cast %134 : vector<8xf32> to vector<8x1xf32>
    %136 = vector.broadcast %135 : vector<8x1xf32> to vector<8x128xf32>
    %137 = arith.cmpf oge, %133, %136 : vector<8x128xf32>
    %cst_58 = arith.constant 1.280000e+02 : f32
    %138 = vector.broadcast %cst_58 : f32 to vector<8x128xf32>
    %139 = arith.select %137, %6, %138 : vector<8x128xi1>, vector<8x128xf32>
    %cst_59 = arith.constant dense<0x7F800000> : vector<8xf32>
    %140 = vector.multi_reduction <minimumf>, %139, %cst_59 [1] : vector<8x128xf32> to vector<8xf32>
    %141 = vector.shape_cast %140 : vector<8xf32> to vector<8x1xf32>
    %142 = vector.broadcast %141 : vector<8x1xf32> to vector<8x128xf32>
    %143 = arith.cmpf oeq, %6, %142 : vector<8x128xf32>
    %144 = arith.extui %143 : vector<8x128xi1> to vector<8x128xi32>
    %145 = arith.sitofp %144 : vector<8x128xi32> to vector<8x128xf32>
    %146 = arith.fptosi %141 : vector<8x1xf32> to vector<8x1xi32>
    %147 = vector.shape_cast %146 : vector<8x1xi32> to vector<1x8x1xi32>
    %148 = vector.shape_cast %147 : vector<1x8x1xi32> to vector<1x8x1xi32>
    %149 = vector.broadcast %148 : vector<1x8x1xi32> to vector<1x8x128xi32>
    %150 = arith.index_cast %c4_i32 : i32 to index
    %c0_60 = arith.constant 0 : index
    %c0_61 = arith.constant 0 : index
    %151 = vector.load %arg6[%150, %c0_60, %c0_61] : memref<5x8x128xi32, #tpu.memory_space<vmem>>, vector<1x8x128xi32>
    tpu.vector_store %arg6[%150, %c0_60, %c0_61], %149 {strides = array<i32>} : memref<5x8x128xi32, #tpu.memory_space<vmem>>, vector<1x8x128xi32>,
    %cst_62 = arith.constant dense<0.000000e+00> : vector<8x32xf32>
    %152 = tpu.matmul %145, %4, %cst_62 {dimension_numbers = #tpu.dot_dimension_numbers<[1], [0], [0], [1], [0, 0, 1, 1], [], []>} : vector<8x128xf32>, vector<128x32xf32>, vector<8x32xf32> -> vector<8x32xf32>
    %cst_63 = arith.constant 5.000000e-01 : f32
    %153 = vector.broadcast %cst_63 : f32 to vector<8x32xf32>
    %154 = arith.mulf %153, %127 : vector<8x32xf32>
    %cst_64 = arith.constant 5.000000e-01 : f32
    %155 = vector.broadcast %cst_64 : f32 to vector<8x32xf32>
    %156 = arith.mulf %155, %152 : vector<8x32xf32>
    %157 = arith.addf %154, %156 : vector<8x32xf32>
    %c5_i32 = arith.constant 5 : i32
    return
  }
}

</mosaic_0001>

<bundles_post_ra>
// kernel: rollout_actions.1
= control target key start
LH: loop header
LB: loop body
LE: loop exit
PB: predicated region body
PF: predicated region fallthrough
CT: control target
= control target key end

     0   :  { %v1701_v0 = vmov 0.0|0.0   ;;  %vm1702_vm0 = vmmov 0   ;;  %v1703_v4 = vmov 0.0   ;;  %vm53_vm1 = vcmask 261120   ;;  %s2035_s1 = inlined_call_operand.vmem [shape: f32[32,32], index: 1, kind: input, shape index: {}]   ;;  %s2036_s3 = inlined_call_operand.vmem [shape: f32[32,128], index: 3, kind: input, shape index: {}]   ;;  %s2037_s0 = inlined_call_operand.vmem [shape: f32[8,32], index: 0, kind: input, shape index: {}]   ;;  %s2038_s2 = inlined_call_operand.vmem [shape: f32[8,32], index: 2, kind: input, shape index: {}]   ;;  %s2039_s4 = inlined_call_operand.vmem [shape: f32[8,128], index: 4, kind: input, shape index: {}]   ;;  %s2040_s5 = inlined_call_operand.vmem [shape: f32[128,32], index: 5, kind: input, shape index: {}]   ;;  %s2041_s6 = inlined_call_operand.vmem [shape: s32[5,8,128], index: 6, kind: output, shape index: {}]  }
   0x1   :  { %1531 = vmatprep.subr.bf16.mxu0 %v1701_v0  ;;  %v23_v1 = vld [vmem:[%s2035_s1] sm:$0xff]  ;;  %v24_v2 = vld [vmem:[%s2035_s1 + $0x8] sm:$0xff]  ;;  %v25_v3 = vld [vmem:[%s2035_s1 + $0x10] sm:$0xff]  ;;  %1289 = vmatprep.mubr.msk.f32.mxu0 %vm1702_vm0, %v1703_v4  ;;  %v49_v48 = vlaneseq  ;;  %v1704_v55 = vmov 1.0  }
   0x2   :  { %v1752_v5 = vpack.c.bf16 %v24_v2, %v23_v1  ;;  %v26_v6 = vld [vmem:[%s2035_s1 + $0x18] sm:$0xff]  ;;  %1537 = vmatprep.subr.bf16.mxu1 %v1701_v0  ;;  %v28_v7 = vld [vmem:[%s2036_s3] sm:$0xff]  ;;  %1300 = vmatprep.mubr.msk.f32.mxu1 %vm1702_vm0, %v1703_v4  ;;  %v29_v8 = vld [vmem:[%s2036_s3 + $0x8] sm:$0xff] }
   0x3   :  { %v1767_v9 = vpack.c.bf16 %v26_v6, %v25_v3  ;;  %v1769_v10 = vpack.c.bf16 %v29_v8, %v28_v7  ;;  %v1778_v11 = vld [vmem:[%s2037_s0] sm:$0xff]  ;;  %v30_v12 = vld [vmem:[%s2036_s3 + $0x10] sm:$0xff]  ;;  %v31_v13 = vld [vmem:[%s2036_s3 + $0x18] sm:$0xff]  ;;  %v50_v49 = vand.u32 127, %v49_v48 }
   0x4   :  { %1533 = vmatpush3.bf16.msra.mxu0 %v1752_v5  ;;  %v1791_v14 = vpack.c.bf16 %v31_v13, %v30_v12  ;;  %v1798_v15 = vld [vmem:[%s2038_s2] sm:$0xff]  ;;  %v34_v25 = vld [vmem:[%s2040_s5 + $0x8] sm:$0xff]  ;;  %v35_v26 = vld [vmem:[%s2040_s5 + $0x10] sm:$0xff]  ;;  %v282_v57 = vmul.f32 0.5, %v1778_v11 }
   0x5   :  { %1534 = vmatprep.subr.bf16.mxu0 %v1701_v0  ;;  %1539 = vmatpush3.bf16.msra.mxu1 %v1769_v10  ;;  %v1811_v20 = vld [vmem:[%s2039_s4] sm:$0xff]  ;;  %v36_v28 = vld [vmem:[%s2040_s5 + $0x18] sm:$0xff]  ;;  %v38_v31 = vld [vmem:[%s2040_s5 + $0x28] sm:$0xff]  ;;  %v1894_v50 = vcvt.s32.f32 %v50_v49 }
   0x6   :  { %1540 = vmatprep.subr.bf16.mxu1 %v1701_v0  ;;  %v33_v24 = vld [vmem:[%s2040_s5] sm:$0xff]  ;;  %v1829_v29 = vpack.c.bf16 %v36_v28, %v35_v26  ;;  %v39_v33 = vld [vmem:[%s2040_s5 + $0x30] sm:$0xff]  ;;  %v40_v34 = vld [vmem:[%s2040_s5 + $0x38] sm:$0xff] }
   0x7   :  { %v1823_v27 = vpack.c.bf16 %v34_v25, %v33_v24  ;;  %v37_v30 = vld [vmem:[%s2040_s5 + $0x20] sm:$0xff]  ;;  %v1849_v35 = vpack.c.bf16 %v40_v34, %v39_v33  ;;  %v42_v37 = vld [vmem:[%s2040_s5 + $0x48] sm:$0xff]  ;;  %v43_v39 = vld [vmem:[%s2040_s5 + $0x50] sm:$0xff] }
   0x8   :  { %1536 = vmatpush3.bf16.msra.mxu0 %v1767_v9  ;;  %v1839_v32 = vpack.c.bf16 %v38_v31, %v37_v30  ;;  %v41_v36 = vld [vmem:[%s2040_s5 + $0x40] sm:$0xff]  ;;  %v44_v40 = vld [vmem:[%s2040_s5 + $0x58] sm:$0xff]  ;;  %v46_v43 = vld [vmem:[%s2040_s5 + $0x68] sm:$0xff] }
   0x9   :  { %1543 = vmatprep.subr.bf16.mxu0 %v1701_v0  ;;  %1542 = vmatpush3.bf16.msra.mxu1 %v1791_v14  ;;  %v1859_v38 = vpack.c.bf16 %v42_v37, %v41_v36  ;;  %v1869_v41 = vpack.c.bf16 %v44_v40, %v43_v39  ;;  %v45_v42 = vld [vmem:[%s2040_s5 + $0x60] sm:$0xff]  ;;  %v47_v45 = vld [vmem:[%s2040_s5 + $0x70] sm:$0xff]  ;;  %v48_v46 = vld [vmem:[%s2040_s5 + $0x78] sm:$0xff] }
   0xa   :  { %1567 = vmatprep.subr.bf16.mxu1 %v1701_v0  ;;  %v1879_v44 = vpack.c.bf16 %v46_v43, %v45_v42  ;;  %v1889_v47 = vpack.c.bf16 %v48_v46, %v47_v45 }
   0xb   :  { %1290 = vmatmul.mubr.msk.f32.vlgmr.msra.gmra.mrb[0].mxu0 %vm53_vm1, %v1778_v11 }
   0xc   :  { %1335 = vmatprep.mubr.msk.f32.mxu0 %vm1702_vm0, %v1703_v4  ;;  %1545 = vmatpush3.bf16.msra.mxu0 %v1823_v27 }
   0xd   :  { %1546 = vmatprep.subr.bf16.mxu0 %v1701_v0 }
  0x10   :  { %1548 = vmatpush3.bf16.msra.mxu0 %v1829_v29 }
  0x11   :  { %1549 = vmatprep.subr.bf16.mxu0 %v1701_v0 }
  0x14   :  { %1551 = vmatpush3.bf16.msra.mxu0 %v1839_v32 }
  0x15   :  { %1552 = vmatprep.subr.bf16.mxu0 %v1701_v0 }
  0x18   :  { %1554 = vmatpush3.bf16.msra.mxu0 %v1849_v35 }
  0x19   :  { %1555 = vmatprep.subr.bf16.mxu0 %v1701_v0 }
  0x1c   :  { %1557 = vmatpush3.bf16.msra.mxu0 %v1859_v38 }
  0x1d   :  { %1558 = vmatprep.subr.bf16.mxu0 %v1701_v0 }
  0x20   :  { %1560 = vmatpush3.bf16.msra.mxu0 %v1869_v41 }
  0x21   :  { %1561 = vmatprep.subr.bf16.mxu0 %v1701_v0 }
  0x24   :  { %1563 = vmatpush3.bf16.msra.mxu0 %v1879_v44 }
  0x25   :  { %1564 = vmatprep.subr.bf16.mxu0 %v1701_v0 }
  0x28   :  { %1566 = vmatpush3.bf16.msra.mxu0 %v1889_v47 }
  0x29   :  { %1603 = vmatprep.subr.bf16.mxu0 %v1701_v0 }
  0xde   :  { %v123_v16 = vpop.f32.mrb[0].mxu0 }
  0xdf   :  { %v124_v17 = vadd.f32 %v123_v16, %v1798_v15  ;;  %v1291_v18 = vpop.f32.mrb[1].mxu0 }
  0xe1   :  { %v127_v19 = vmax.f32 %v124_v17, 0.0 }
  0xe3   :  { %1301 = vmatmul.mubr.msk.f32.vlgmr.msra.gmra.mrb[0].mxu1 %vm53_vm1, %v127_v19 }
  0xe4   :  { %1569 = vmatpush3.bf16.msra.mxu1 %v1752_v5  ;;  %1346 = vmatprep.mubr.msk.f32.mxu1 %vm1702_vm0, %v1703_v4 }
  0xe5   :  { %1570 = vmatprep.subr.bf16.mxu1 %v1701_v0 }
  0xe8   :  { %1572 = vmatpush3.bf16.msra.mxu1 %v1767_v9 }
  0xe9   :  { %1573 = vmatprep.subr.bf16.mxu1 %v1701_v0 }
 0x1b6   :  { %v197_v21 = vpop.f32.mrb[0].mxu1 }
 0x1b7   :  { %v198_v22 = vadd.f32 %v197_v21, %v1811_v20  ;;  %v1302_v23 = vpop.f32.mrb[1].mxu1 }
 0x1b9   :  { %201 = vmax.xlane.f32.xlu0 %v198_v22 }
 0x246   :  { %v202_v51 = vpop.xlane.xlu0 %201 }
 0x247   :  { %vm203_vm2 = vcmp.ge.f32.partialorder %v198_v22, %v202_v51 }
 0x248   :  { %v204_v52 = vsel %vm203_vm2, %v1894_v50, 128.0 }
 0x249   :  { %205 = vmin.xlane.f32.xlu0 %v204_v52 }
 0x2d6   :  { %v206_v53 = vpop.xlane.xlu0 %205 }
 0x2d7   :  { %vm207_vm3 = vcmp.eq.f32.partialorder %v1894_v50, %v206_v53  ;;  %v1687_v54 = vtrunc.f32 %v206_v53 }
 0x2d8   :  { %1336 = vmatmul.mubr.msk.f32.vlgmr.msra.gmra.mrb[2].mxu0 %vm207_vm3, %v1704_v55 }
 0x2d9   :  { %v1688_v56 = vcvt.f32.s32 %v1687_v54  ;;  %1605 = vmatpush3.bf16.msra.mxu0 %v1752_v5  ;;  %1403 = vmatprep.mubr.msk.f32.mxu0 %vm1702_vm0, %v1703_v4 }
 0x2da   :  { %1606 = vmatprep.subr.bf16.mxu0 %v1701_v0 }
 0x2db   :  { %211 = vst [vmem:[%s2041_s6] sm:$0xff] %v1688_v56 }
 0x2dd   :  { %1608 = vmatpush3.bf16.msra.mxu0 %v1767_v9 }
 0x2de   :  { %1609 = vmatprep.subr.bf16.mxu0 %v1701_v0 }
 0x3ab   :  { %v278_v58 = vpop.f32.mrb[2].mxu0 }
 0x3ac   :  { %v283_v59 = vmul.f32 0.5, %v278_v58  ;;  %v1337_v60 = vpop.f32.mrb[3].mxu0 }
 0x3ae   :  { %v284_v61 = vadd.f32 %v283_v59, %v282_v57 }
 0x3b0   :  { %1347 = vmatmul.mubr.msk.f32.vlgmr.msra.gmra.mrb[2].mxu1 %vm53_vm1, %v284_v61  ;;  %v514_v18 = vmul.f32 0.5, %v284_v61 }
 0x3b1   :  { %1575 = vmatpush3.bf16.msra.mxu1 %v1769_v10  ;;  %1357 = vmatprep.mubr.msk.f32.mxu1 %vm1702_vm0, %v1703_v4 }
 0x3b2   :  { %1576 = vmatprep.subr.bf16.mxu1 %v1701_v0 }
 0x3b5   :  { %1578 = vmatpush3.bf16.msra.mxu1 %v1791_v14 }
 0x3b6   :  { %1579 = vmatprep.subr.bf16.mxu1 %v1701_v0 }
 0x483   :  { %v354_v62 = vpop.f32.mrb[2].mxu1 }
 0x484   :  { %v355_v63 = vadd.f32 %v354_v62, %v1798_v15  ;;  %v1348_v1 = vpop.f32.mrb[3].mxu1 }
 0x486   :  { %v358_v2 = vmax.f32 %v355_v63, 0.0 }
 0x488   :  { %1358 = vmatmul.mubr.msk.f32.vlgmr.msra.gmra.mrb[4].mxu1 %vm53_vm1, %v358_v2 }
 0x489   :  { %1581 = vmatpush3.bf16.msra.mxu1 %v1823_v27  ;;  %1392 = vmatprep.mubr.msk.f32.mxu1 %vm1702_vm0, %v1703_v4 }
 0x48a   :  { %1582 = vmatprep.subr.bf16.mxu1 %v1701_v0 }
 0x48d   :  { %1584 = vmatpush3.bf16.msra.mxu1 %v1829_v29 }
 0x48e   :  { %1585 = vmatprep.subr.bf16.mxu1 %v1701_v0 }
 0x491   :  { %1587 = vmatpush3.bf16.msra.mxu1 %v1839_v32 }
 0x492   :  { %1588 = vmatprep.subr.bf16.mxu1 %v1701_v0 }
 0x495   :  { %1590 = vmatpush3.bf16.msra.mxu1 %v1849_v35 }
 0x496   :  { %1591 = vmatprep.subr.bf16.mxu1 %v1701_v0 }
 0x499   :  { %1593 = vmatpush3.bf16.msra.mxu1 %v1859_v38 }
 0x49a   :  { %1594 = vmatprep.subr.bf16.mxu1 %v1701_v0 }
 0x49d   :  { %1596 = vmatpush3.bf16.msra.mxu1 %v1869_v41 }
 0x49e   :  { %1597 = vmatprep.subr.bf16.mxu1 %v1701_v0 }
 0x4a1   :  { %1599 = vmatpush3.bf16.msra.mxu1 %v1879_v44 }
 0x4a2   :  { %1600 = vmatprep.subr.bf16.mxu1 %v1701_v0 }
 0x4a5   :  { %1602 = vmatpush3.bf16.msra.mxu1 %v1889_v47 }
 0x4a6   :  { %1639 = vmatprep.subr.bf16.mxu1 %v1701_v0 }
 0x55b   :  { %v428_v3 = vpop.f32.mrb[4].mxu1 }
 0x55c   :  { %v429_v6 = vadd.f32 %v428_v3, %v1811_v20  ;;  %v1359_v7 = vpop.f32.mrb[5].mxu1 }
 0x55e   :  { %432 = vmax.xlane.f32.xlu1 %v429_v6 }
 0x5eb   :  { %v433_v8 = vpop.xlane.xlu1 %432 }
 0x5ec   :  { %vm434_vm4 = vcmp.ge.f32.partialorder %v429_v6, %v433_v8 }
 0x5ed   :  { %v435_v11 = vsel %vm434_vm4, %v1894_v50, 128.0 }
 0x5ee   :  { %436 = vmin.xlane.f32.xlu1 %v435_v11 }
 0x67b   :  { %v437_v12 = vpop.xlane.xlu1 %436 }
 0x67c   :  { %vm438_vm5 = vcmp.eq.f32.partialorder %v1894_v50, %v437_v12  ;;  %v1689_v13 = vtrunc.f32 %v437_v12 }
 0x67d   :  { %1393 = vmatmul.mubr.msk.f32.vlgmr.msra.gmra.mrb[6].mxu1 %vm438_vm5, %v1704_v55 }
 0x67e   :  { %v1690_v16 = vcvt.f32.s32 %v1689_v13  ;;  %1641 = vmatpush3.bf16.msra.mxu1 %v1752_v5  ;;  %1460 = vmatprep.mubr.msk.f32.mxu1 %vm1702_vm0, %v1703_v4 }
 0x67f   :  { %1642 = vmatprep.subr.bf16.mxu1 %v1701_v0 }
 0x680   :  { %1148 = vst [vmem:[%s2041_s6 + $0x8] sm:$0xff] %v1690_v16 }
 0x682   :  { %1644 = vmatpush3.bf16.msra.mxu1 %v1767_v9 }
 0x683   :  { %1645 = vmatprep.subr.bf16.mxu1 %v1701_v0 }
 0x750   :  { %v510_v17 = vpop.f32.mrb[6].mxu1 }
 0x751   :  { %v515_v19 = vmul.f32 0.5, %v510_v17  ;;  %v1394_v21 = vpop.f32.mrb[7].mxu1 }
 0x753   :  { %v516_v22 = vadd.f32 %v515_v19, %v514_v18 }
 0x755   :  { %1404 = vmatmul.mubr.msk.f32.vlgmr.msra.gmra.mrb[4].mxu0 %vm53_vm1, %v516_v22  ;;  %v746_v42 = vmul.f32 0.5, %v516_v22 }
 0x756   :  { %1611 = vmatpush3.bf16.msra.mxu0 %v1769_v10  ;;  %1414 = vmatprep.mubr.msk.f32.mxu0 %vm1702_vm0, %v1703_v4 }
 0x757   :  { %1612 = vmatprep.subr.bf16.mxu0 %v1701_v0 }
 0x75a   :  { %1614 = vmatpush3.bf16.msra.mxu0 %v1791_v14 }
 0x75b   :  { %1615 = vmatprep.subr.bf16.mxu0 %v1701_v0 }
 0x828   :  { %v586_v23 = vpop.f32.mrb[4].mxu0 }
 0x829   :  { %v587_v24 = vadd.f32 %v586_v23, %v1798_v15  ;;  %v1405_v25 = vpop.f32.mrb[5].mxu0 }
 0x82b   :  { %v590_v26 = vmax.f32 %v587_v24, 0.0 }
 0x82d   :  { %1415 = vmatmul.mubr.msk.f32.vlgmr.msra.gmra.mrb[6].mxu0 %vm53_vm1, %v590_v26 }
 0x82e   :  { %1617 = vmatpush3.bf16.msra.mxu0 %v1823_v27  ;;  %1449 = vmatprep.mubr.msk.f32.mxu0 %vm1702_vm0, %v1703_v4 }
 0x82f   :  { %1618 = vmatprep.subr.bf16.mxu0 %v1701_v0 }
 0x832   :  { %1620 = vmatpush3.bf16.msra.mxu0 %v1829_v29 }
 0x833   :  { %1621 = vmatprep.subr.bf16.mxu0 %v1701_v0 }
 0x836   :  { %1623 = vmatpush3.bf16.msra.mxu0 %v1839_v32 }
 0x837   :  { %1624 = vmatprep.subr.bf16.mxu0 %v1701_v0 }
 0x83a   :  { %1626 = vmatpush3.bf16.msra.mxu0 %v1849_v35 }
 0x83b   :  { %1627 = vmatprep.subr.bf16.mxu0 %v1701_v0 }
 0x83e   :  { %1629 = vmatpush3.bf16.msra.mxu0 %v1859_v38 }
 0x83f   :  { %1630 = vmatprep.subr.bf16.mxu0 %v1701_v0 }
 0x842   :  { %1632 = vmatpush3.bf16.msra.mxu0 %v1869_v41 }
 0x843   :  { %1633 = vmatprep.subr.bf16.mxu0 %v1701_v0 }
 0x846   :  { %1635 = vmatpush3.bf16.msra.mxu0 %v1879_v44 }
 0x847   :  { %1636 = vmatprep.subr.bf16.mxu0 %v1701_v0 }
 0x84a   :  { %1638 = vmatpush3.bf16.msra.mxu0 %v1889_v47 }
 0x84b   :  { %1675 = vmatprep.subr.bf16.mxu0 %v1701_v0 }
 0x900   :  { %v660_v28 = vpop.f32.mrb[6].mxu0 }
 0x901   :  { %v661_v30 = vadd.f32 %v660_v28, %v1811_v20  ;;  %v1416_v31 = vpop.f32.mrb[7].mxu0 }
 0x903   :  { %664 = vmax.xlane.f32.xlu0 %v661_v30 }
 0x990   :  { %v665_v33 = vpop.xlane.xlu0 %664 }
 0x991   :  { %vm666_vm6 = vcmp.ge.f32.partialorder %v661_v30, %v665_v33 }
 0x992   :  { %v667_v34 = vsel %vm666_vm6, %v1894_v50, 128.0 }
 0x993   :  { %668 = vmin.xlane.f32.xlu1 %v667_v34 }
 0xa20   :  { %v669_v36 = vpop.xlane.xlu1 %668 }
 0xa21   :  { %vm670_vm7 = vcmp.eq.f32.partialorder %v1894_v50, %v669_v36  ;;  %v1691_v37 = vtrunc.f32 %v669_v36 }
 0xa22   :  { %1450 = vmatmul.mubr.msk.f32.vlgmr.msra.gmra.mrb[8].mxu0 %vm670_vm7, %v1704_v55 }
 0xa23   :  { %v1692_v39 = vcvt.f32.s32 %v1691_v37  ;;  %1677 = vmatpush3.bf16.msra.mxu0 %v1752_v5  ;;  %1517 = vmatprep.mubr.msk.f32.mxu0 %vm1702_vm0, %v1703_v4 }
 0xa24   :  { %1678 = vmatprep.subr.bf16.mxu0 %v1701_v0 }
 0xa25   :  { %1153 = vst [vmem:[%s2041_s6 + $0x10] sm:$0xff] %v1692_v39 }
 0xa27   :  { %1680 = vmatpush3.bf16.msra.mxu0 %v1767_v9 }
 0xa28   :  { %1681 = vmatprep.subr.bf16.mxu0 %v1701_v0 }
 0xaf5   :  { %v742_v40 = vpop.f32.mrb[8].mxu0 }
 0xaf6   :  { %v747_v43 = vmul.f32 0.5, %v742_v40  ;;  %v1451_v45 = vpop.f32.mrb[9].mxu0 }
 0xaf8   :  { %v748_v46 = vadd.f32 %v747_v43, %v746_v42 }
 0xafa   :  { %1461 = vmatmul.mubr.msk.f32.vlgmr.msra.gmra.mrb[8].mxu1 %vm53_vm1, %v748_v46  ;;  %v978_v52 = vmul.f32 0.5, %v748_v46 }
 0xafb   :  { %1647 = vmatpush3.bf16.msra.mxu1 %v1769_v10  ;;  %1471 = vmatprep.mubr.msk.f32.mxu1 %vm1702_vm0, %v1703_v4 }
 0xafc   :  { %1648 = vmatprep.subr.bf16.mxu1 %v1701_v0 }
 0xaff   :  { %1650 = vmatpush3.bf16.msra.mxu1 %v1791_v14 }
 0xb00   :  { %1651 = vmatprep.subr.bf16.mxu1 %v1701_v0 }
 0xbcd   :  { %v818_v5 = vpop.f32.mrb[8].mxu1 }
 0xbce   :  { %v819_v9 = vadd.f32 %v818_v5, %v1798_v15  ;;  %v1462_v48 = vpop.f32.mrb[9].mxu1 }
 0xbd0   :  { %v822_v49 = vmax.f32 %v819_v9, 0.0 }
 0xbd2   :  { %1472 = vmatmul.mubr.msk.f32.vlgmr.msra.gmra.mrb[10].mxu1 %vm53_vm1, %v822_v49 }
 0xbd3   :  { %1653 = vmatpush3.bf16.msra.mxu1 %v1823_v27  ;;  %1506 = vmatprep.mubr.msk.f32.mxu1 %vm1702_vm0, %v1703_v4 }
 0xbd4   :  { %1654 = vmatprep.subr.bf16.mxu1 %v1701_v0 }
 0xbd7   :  { %1656 = vmatpush3.bf16.msra.mxu1 %v1829_v29 }
 0xbd8   :  { %1657 = vmatprep.subr.bf16.mxu1 %v1701_v0 }
 0xbdb   :  { %1659 = vmatpush3.bf16.msra.mxu1 %v1839_v32 }
 0xbdc   :  { %1660 = vmatprep.subr.bf16.mxu1 %v1701_v0 }
 0xbdf   :  { %1662 = vmatpush3.bf16.msra.mxu1 %v1849_v35 }
 0xbe0   :  { %1663 = vmatprep.subr.bf16.mxu1 %v1701_v0 }
 0xbe3   :  { %1665 = vmatpush3.bf16.msra.mxu1 %v1859_v38 }
 0xbe4   :  { %1666 = vmatprep.subr.bf16.mxu1 %v1701_v0 }
 0xbe7   :  { %1668 = vmatpush3.bf16.msra.mxu1 %v1869_v41 }
 0xbe8   :  { %1669 = vmatprep.subr.bf16.mxu1 %v1701_v0 }
 0xbeb   :  { %1671 = vmatpush3.bf16.msra.mxu1 %v1879_v44 }
 0xbec   :  { %1672 = vmatprep.subr.bf16.mxu1 %v1701_v0 }
 0xbef   :  { %1674 = vmatpush3.bf16.msra.mxu1 %v1889_v47 }
 0xca5   :  { %v892_v27 = vpop.f32.mrb[10].mxu1 }
 0xca6   :  { %v893_v29 = vadd.f32 %v892_v27, %v1811_v20  ;;  %v1473_v32 = vpop.f32.mrb[11].mxu1 }
 0xca8   :  { %896 = vmax.xlane.f32.xlu0 %v893_v29 }
 0xd35   :  { %v897_v35 = vpop.xlane.xlu0 %896 }
 0xd36   :  { %vm898_vm8 = vcmp.ge.f32.partialorder %v893_v29, %v897_v35 }
 0xd37   :  { %v899_v38 = vsel %vm898_vm8, %v1894_v50, 128.0 }
 0xd38   :  { %900 = vmin.xlane.f32.xlu1 %v899_v38 }
 0xdc5   :  { %v901_v51 = vpop.xlane.xlu1 %900 }
 0xdc6   :  { %vm902_vm9 = vcmp.eq.f32.partialorder %v1894_v50, %v901_v51  ;;  %v1693_v41 = vtrunc.f32 %v901_v51 }
 0xdc7   :  { %1507 = vmatmul.mubr.msk.f32.vlgmr.msra.gmra.mrb[12].mxu1 %vm902_vm9, %v1704_v55 }
 0xdc8   :  { %v1694_v44 = vcvt.f32.s32 %v1693_v41 }
 0xdca   :  { %1158 = vst [vmem:[%s2041_s6 + $0x18] sm:$0xff] %v1694_v44 }
 0xe9a   :  { %v974_v47 = vpop.f32.mrb[12].mxu1 }
 0xe9b   :  { %v979_v53 = vmul.f32 0.5, %v974_v47  ;;  %v1508_v54 = vpop.f32.mrb[13].mxu1 }
 0xe9d   :  { %v980_v56 = vadd.f32 %v979_v53, %v978_v52 }
 0xe9f   :  { %1518 = vmatmul.mubr.msk.f32.vlgmr.msra.gmra.mrb[10].mxu0 %vm53_vm1, %v980_v56 }
 0xea0   :  { %1683 = vmatpush3.bf16.msra.mxu0 %v1769_v10  ;;  %1528 = vmatprep.mubr.msk.f32.mxu0 %vm1702_vm0, %v1703_v4 }
 0xea1   :  { %1684 = vmatprep.subr.bf16.mxu0 %v1701_v0 }
 0xea4   :  { %1686 = vmatpush3.bf16.msra.mxu0 %v1791_v14 }
 0xf72   :  { %v1050_v55 = vpop.f32.mrb[10].mxu0 }
 0xf73   :  { %v1051_v57 = vadd.f32 %v1050_v55, %v1798_v15  ;;  %v1519_v58 = vpop.f32.mrb[11].mxu0 }
 0xf75   :  { %v1054_v59 = vmax.f32 %v1051_v57, 0.0 }
 0xf77   :  { %1529 = vmatmul.mubr.msk.f32.vlgmr.msra.gmra.mrb[12].mxu0 %vm53_vm1, %v1054_v59 }
0x104a   :  { %v1124_v60 = vpop.f32.mrb[12].mxu0 }
0x104b   :  { %v1125_v61 = vadd.f32 %v1124_v60, %v1811_v20  ;;  %v1530_v62 = vpop.f32.mrb[13].mxu0 }
0x104d   :  { %1128 = vmax.xlane.f32.xlu0 %v1125_v61 }
0x10da   :  { %v1129_v10 = vpop.xlane.xlu0 %1128 }
0x10db   :  { %vm1130_vm10 = vcmp.ge.f32.partialorder %v1125_v61, %v1129_v10 }
0x10dc   :  { %v1131_v4 = vsel %vm1130_vm10, %v1894_v50, 128.0 }
0x10dd   :  { %1132 = vmin.xlane.f32.xlu1 %v1131_v4 }
0x116a   :  { %v1133_v0 = vpop.xlane.xlu1 %1132 }
0x116b   :  { %v1695_v63 = vtrunc.f32 %v1133_v0 }
0x116d   :  { %v1696_v14 = vcvt.f32.s32 %v1695_v63 }
0x116f   :  { %1162 = vst [vmem:[%s2041_s6 + $0x20] sm:$0xff] %v1696_v14 }

</bundles_post_ra>
